<compile_context>
chip_gen: v7x
topology: tpu7x:2x2x1
jax: 0.10.0
libtpu: 0.0.40
codegen_flags: <defaults>
</compile_context>

<pallas_src>
import functools

import numpy as np

import jax
import jax.numpy as jnp
from jax import lax
from jax.experimental import pallas as pl
from jax.experimental.pallas import tpu as pltpu

PRIMITIVES = [
    'none', 'max_pool_3x3', 'avg_pool_3x3', 'skip_connect',
    'sep_conv_3x3', 'sep_conv_5x5', 'dil_conv_3x3', 'dil_conv_5x5',
]
# alpha slots inside the kernel (compacted, 'none' dropped)
_EDGE_ORDER = ['max_pool_3x3', 'avg_pool_3x3', 'skip_connect',
               'sep_conv_3x3', 'sep_conv_5x5', 'dil_conv_3x3', 'dil_conv_5x5']

EPS = 1e-5
_NEG = -1e30            # max-pool padding value (fine for f32 activations)

_VMEM = pl.BlockSpec(memory_space=pltpu.MemorySpace.VMEM)
_SMEM = pl.BlockSpec(memory_space=pltpu.MemorySpace.SMEM)


def _conv_offsets(K, dil):
    p = dil * (K - 1) // 2
    return [(dil * kh - p, dil * kw - p) for kh in range(K) for kw in range(K)]

OFF_S3 = _conv_offsets(3, 1)          # sep 3x3 depthwise taps
OFF_S5 = _conv_offsets(5, 1)          # sep 5x5 depthwise taps
OFF_D3 = _conv_offsets(3, 2)          # dil 3x3 (dilation 2) taps
OFF_D5 = _conv_offsets(5, 2)          # dil 5x5 (dilation 2) taps
OFF_POOL = _conv_offsets(3, 1)        # 3x3 pool window
# stage-A im2col offsets shared by {sep3.dw1, sep5.dw1, dil3, dil5}: 41 offsets
OFFSETS_A = OFF_S5 + [o for o in OFF_D5 if o not in OFF_S5]


# ----------------------------- roll-direction probe -----------------------------
# pltpu.roll is the only lane-rotation primitive we rely on; probe its shift
# convention once at startup so the main kernel's shift signs are always right.

def _roll_probe_kernel(x_ref, o_ref):
    o_ref[...] = pltpu.roll(x_ref[...], 1, 1)


def detect_roll_like_jnp():
    x = jnp.broadcast_to(jnp.arange(128, dtype=jnp.float32)[None, :], (8, 128))
    y = pl.pallas_call(
        _roll_probe_kernel,
        out_shape=jax.ShapeDtypeStruct((8, 128), jnp.float32),
        in_specs=[_VMEM], out_specs=_VMEM,
    )(x)
    # jnp.roll semantics: out[0] = x[-1] = 127 for shift=+1
    return bool(np.asarray(y)[0, 0] == 127.0)


# ----------------------------- the fused cell kernel -----------------------------

def _cell_kernel(alpha_ref, x_ref, wpre_ref, wa_ref, wb_ref, o_ref,
                 *, N, H, W, C, steps, multiplier, roll_like_jnp):
    """Whole normal cell, fused.

    alpha_ref : SMEM (E, 7) f32   per-edge alphas in _EDGE_ORDER (0 if switched off)
    x_ref     : VMEM (Cin_pad, N*H*W) f32  rows [0:Cpp]=s0, [Cpp:Cpp+Cp]=s1, rest 0
    wpre_ref  : VMEM (2C, Cin_pad)  block-diag preprocess 1x1 weights
    wa_ref    : VMEM (E, 4C, 41*C)  fused dw+1x1 weights of {sep3.1, sep5.1, dil3, dil5}
    wb_ref    : VMEM (E, 2C, 34*C)  fused dw+1x1 weights of {sep3.2, sep5.2}
    o_ref     : VMEM (multiplier*C, N*H*W)  concat of the last `multiplier` node states
    Layout: channels on sublanes, flat n*H*W + h*W + w on lanes (lane-dense).
    """
    f32 = jnp.float32
    NHW = N * H * W

    # lane-index decomposition -> validity masks for shifted taps (zero padding)
    flat = lax.broadcasted_iota(jnp.int32, (C, NHW), 1)
    hh = (flat // W) % H
    ww = flat % W

    mask_cache = {}

    def off_mask(dh, dw):                      # (C, NHW) bool, memoized
        key = (dh, dw)
        if key not in mask_cache:
            mask_cache[key] = ((hh + dh >= 0) & (hh + dh < H) &
                               (ww + dw >= 0) & (ww + dw < W))
        return mask_cache[key]

    def rolled(x, dh, dw):                     # x[:, f] <- x[:, f + dh*W + dw] (wrapped)
        s = dh * W + dw
        if s == 0:
            return x
        shift = (-s) % NHW if roll_like_jnp else (s % NHW)
        return pltpu.roll(x, shift, 1)

    def shifted0(x, dh, dw):                   # zero-padded spatial shift
        if dh == 0 and dw == 0:
            return x
        return jnp.where(off_mask(dh, dw), rolled(x, dh, dw), 0.0)

    def im2col(x, offsets):                    # (len(offsets)*C, NHW)
        return jnp.concatenate([shifted0(x, dh, dw) for dh, dw in offsets], axis=0)

    def bn_rows(y, scales):
        # training-mode BatchNorm2d(affine=False) per row (=channel), with the
        # MixedOp alpha folded into the normalization scale.
        mean = jnp.sum(y, axis=1, keepdims=True) * (1.0 / NHW)
        yc = y - mean
        var = jnp.sum(yc * yc, axis=1, keepdims=True) * (1.0 / NHW)
        inv = lax.rsqrt(var + EPS)
        if all(isinstance(s, float) and s == 1.0 for s in scales):
            return yc * inv
        cols = [jnp.full((C, 1), 1.0, f32) * s for s in scales]
        sc = cols[0] if len(cols) == 1 else jnp.concatenate(cols, axis=0)
        return yc * (inv * sc)

    # avg-pool reciprocal window counts (count_include_pad=False), shared by all edges
    cnt = jnp.ones((C, NHW), f32)
    for dh, dw in OFF_POOL:
        if dh == 0 and dw == 0:
            continue
        cnt = cnt + off_mask(dh, dw).astype(f32)
    inv_cnt = 1.0 / cnt

    # ---- fused preprocess0 / preprocess1: ReLU -> 1x1 conv -> BN (block-diag batched)
    xs = jnp.maximum(x_ref[...], 0.0)
    pre = bn_rows(jnp.dot(wpre_ref[...], xs, preferred_element_type=f32), [1.0, 1.0])
    s0p = pre[0:C, :]
    s1p = pre[C:2 * C, :]

    def edge(e, h):
        a = lambda k: alpha_ref[e, k]          # SMEM scalar reads
        relu_h = jnp.maximum(h, 0.0)

        # stage A: {sep3 dw1+pw1, sep5 dw1+pw1, dil3, dil5} -> one block-diag matmul
        colA = im2col(relu_h, OFFSETS_A)                                  # (41C, NHW)
        yA = jnp.dot(wa_ref[e], colA, preferred_element_type=f32)        # (4C, NHW)
        bnA = bn_rows(yA, [1.0, 1.0, a(5), a(6)])                         # dil alphas folded
        acc = bnA[2 * C:3 * C, :] + bnA[3 * C:4 * C, :]                   # dil3 + dil5

        # stage B: {sep3 dw2+pw2, sep5 dw2+pw2} -> one block-diag matmul
        h3 = jnp.maximum(bnA[0:C, :], 0.0)
        h5 = jnp.maximum(bnA[C:2 * C, :], 0.0)
        colB = jnp.concatenate([im2col(h3, OFF_S3), im2col(h5, OFF_S5)], axis=0)
        yB = jnp.dot(wb_ref[e], colB, preferred_element_type=f32)         # (2C, NHW)
        bnB = bn_rows(yB, [a(3), a(4)])                                   # sep alphas folded
        acc = acc + bnB[0:C, :] + bnB[C:2 * C, :]

        # pools (share the rolled taps), batched BN with alphas folded
        m = h
        ssum = h
        for dh, dw in OFF_POOL:
            if dh == 0 and dw == 0:
                continue
            r = rolled(h, dh, dw)
            mk = off_mask(dh, dw)
            m = jnp.maximum(m, jnp.where(mk, r, _NEG))
            ssum = ssum + jnp.where(mk, r, 0.0)
        pool = jnp.concatenate([m, ssum * inv_cnt], axis=0)               # (2C, NHW)
        bnP = bn_rows(pool, [a(0), a(1)])
        acc = acc + bnP[0:C, :] + bnP[C:2 * C, :]

        # skip_connect (identity, stride 1); 'none' contributes exactly 0
        return acc + a(2) * h

    # node loop (static): node_i = sum over edges from all previous states
    states = [s0p, s1p]
    e = 0
    for _ in range(steps):
        s_new = None
        for h in states:
            contrib = edge(e, h)
            s_new = contrib if s_new is None else s_new + contrib
            e += 1
        states.append(s_new)

    o_ref[...] = jnp.concatenate(states[-multiplier:], axis=0)            # lane-dense slab


# ----------------------------- wrapper -----------------------------

def _edge_alphas(alphas_row, switch):
    """Compacted-alpha mapping: the k-th switched-on primitive uses alphas_row[k].
    Switched-off primitives (and 'none') contribute exactly 0."""
    pos, k = {}, 0
    for i, name in enumerate(PRIMITIVES):
        if switch[i]:
            pos[name] = k
            k += 1
    vals = []
    for name in _EDGE_ORDER:
        vals.append(alphas_row[pos[name]] if name in pos
                    else jnp.zeros((), jnp.float32))
    return jnp.stack(vals).astype(jnp.float32)


def cell_forward(params, s0_nchw, s1_nchw, weights, switches, steps, multiplier,
                 roll_like_jnp=True):
    """Cell.forward. Inputs NCHW; compute lane-dense (C, N*H*W); output NCHW."""
    N, Cpp, H, W = s0_nchw.shape
    Cp = s1_nchw.shape[1]
    C = params['wpre'].shape[0] // 2
    Cin_pad = params['wpre'].shape[1]
    NHW = N * H * W

    # lane-dense input slab: rows [0:Cpp]=s0, [Cpp:Cpp+Cp]=s1, rest zero-pad
    s0 = jnp.transpose(s0_nchw, (1, 0, 2, 3)).reshape(Cpp, NHW).astype(jnp.float32)
    s1 = jnp.transpose(s1_nchw, (1, 0, 2, 3)).reshape(Cp, NHW).astype(jnp.float32)
    parts = [s0, s1]
    pad_rows = Cin_pad - (Cpp + Cp)
    if pad_rows:
        parts.append(jnp.zeros((pad_rows, NHW), jnp.float32))
    x_slab = jnp.concatenate(parts, axis=0)

    alphas7 = jnp.stack([_edge_alphas(weights[e], switches[e])
                         for e in range(len(switches))], axis=0)          # (E, 7)

    kernel = functools.partial(
        _cell_kernel, N=N, H=H, W=W, C=C, steps=steps,
        multiplier=multiplier, roll_like_jnp=roll_like_jnp)

    out_slab = pl.pallas_call(
        kernel,
        out_shape=jax.ShapeDtypeStruct((multiplier * C, NHW), jnp.float32),
        in_specs=[_SMEM, _VMEM, _VMEM, _VMEM, _VMEM],
        out_specs=_VMEM,
        # < 2 MiB live; well under the 32 MiB scoped default and v7x's 64 MiB physical
        compiler_params=pltpu.CompilerParams(vmem_limit_bytes=32 * 1024 * 1024),
    )(alphas7, x_slab, params['wpre'], params['wa'], params['wb'])

    out = out_slab.reshape(multiplier * C, N, H, W)
    return jnp.transpose(out, (1, 0, 2, 3))                               # NCHW


# ----------------------------- parameter init / packing -----------------------------

def init_params(key, C_prev_prev, C_prev, C, num_edges):
    keys = jax.random.split(key, 2 + num_edges)

    def w(k, shape, fan_in):
        return jax.random.normal(k, shape, jnp.float32) / jnp.sqrt(float(fan_in))

    params = {
        'pre0': w(keys[0], (C, C_prev_prev), C_prev_prev),   # Conv2d 1x1 (C_out, C_in)
        'pre1': w(keys[1], (C, C_prev), C_prev),
        'edges': [],
    }
    for e in range(num_edges):
        ek = jax.random.split(keys[2 + e], 12)
        params['edges'].append({
            'sep_conv_3x3': {'dw1': w(ek[0], (C, 9), 9),   'pw1': w(ek[1], (C, C), C),
                             'dw2': w(ek[2], (C, 9), 9),   'pw2': w(ek[3], (C, C), C)},
            'sep_conv_5x5': {'dw1': w(ek[4], (C, 25), 25), 'pw1': w(ek[5], (C, C), C),
                             'dw2': w(ek[6], (C, 25), 25), 'pw2': w(ek[7], (C, C), C)},
            'dil_conv_3x3': {'dw': w(ek[8], (C, 9), 9),    'pw': w(ek[9], (C, C), C)},
            'dil_conv_5x5': {'dw': w(ek[10], (C, 25), 25), 'pw': w(ek[11], (C, C), C)},
        })
    return params


def pack_params(raw, C_prev_prev, C_prev, C):
    """Fold every depthwise conv into its following 1x1 conv (per-tap column
    scaling) and block-diagonal-batch the ops, so each fused edge needs exactly
    two matmul weight slabs (stage A and stage B); preprocess weights are packed
    block-diagonally too."""
    Cin = C_prev_prev + C_prev
    Cin_pad = -(-Cin // 8) * 8
    wpre = np.zeros((2 * C, Cin_pad), np.float32)
    wpre[0:C, 0:C_prev_prev] = np.asarray(raw['pre0'])
    wpre[C:2 * C, C_prev_prev:Cin] = np.asarray(raw['pre1'])

    idxA = {o: i for i, o in enumerate(OFFSETS_A)}
    nA = len(OFFSETS_A)

    was, wbs = [], []
    for e in raw['edges']:
        s3, s5 = e['sep_conv_3x3'], e['sep_conv_5x5']
        d3, d5 = e['dil_conv_3x3'], e['dil_conv_5x5']

        wa = np.zeros((4 * C, nA * C), np.float32)
        for op_i, (pw, dw, offs) in enumerate([
                (s3['pw1'], s3['dw1'], OFF_S3),
                (s5['pw1'], s5['dw1'], OFF_S5),
                (d3['pw'],  d3['dw'],  OFF_D3),
                (d5['pw'],  d5['dw'],  OFF_D5)]):
            pw = np.asarray(pw)
            dw = np.asarray(dw)
            for t, o in enumerate(offs):
                j = idxA[o]
                # fused (dw -> 1x1): block[out, in] = pw[out, in] * dw[in, tap]
                wa[op_i * C:(op_i + 1) * C, j * C:(j + 1) * C] = pw * dw[:, t][None, :]

        wb = np.zeros((2 * C, (len(OFF_S3) + len(OFF_S5)) * C), np.float32)
        pw, dw = np.asarray(s3['pw2']), np.asarray(s3['dw2'])
        for t in range(len(OFF_S3)):
            wb[0:C, t * C:(t + 1) * C] = pw * dw[:, t][None, :]
        pw, dw = np.asarray(s5['pw2']), np.asarray(s5['dw2'])
        base = len(OFF_S3) * C
        for t in range(len(OFF_S5)):
            wb[C:2 * C, base + t * C:base + (t + 1) * C] = pw * dw[:, t][None, :]

        was.append(wa)
        wbs.append(wb)

    return {'wpre': jnp.asarray(wpre),
            'wa': jnp.asarray(np.stack(was)),
            'wb': jnp.asarray(np.stack(wbs))}


# ----------------------------- main -----------------------------

if __name__ == "__main__":
    steps, multiplier = 2, 2
    C_prev_prev, C_prev, C = 6, 6, 8
    N, H, W = 2, 8, 8                       # N*H*W = 128 -> one full vreg per channel slab
    num_edges = sum(2 + i for i in range(steps))            # 5 edges
    switches = [[True] * len(PRIMITIVES) for _ in range(num_edges)]

    key = jax.random.PRNGKey(0)
    k0, k1, ka, kp = jax.random.split(key, 4)
    s0 = jax.random.normal(k0, (N, C_prev_prev, H, W), jnp.float32)      # NCHW
    s1 = jax.random.normal(k1, (N, C_prev, H, W), jnp.float32)           # NCHW
    alphas = jax.nn.softmax(
        jax.random.normal(ka, (num_edges, len(PRIMITIVES)), jnp.float32), axis=-1)
    params = pack_params(init_params(kp, C_prev_prev, C_prev, C, num_edges),
                         C_prev_prev, C_prev, C)

    roll_like_jnp = detect_roll_like_jnp()

    run = jax.jit(lambda p, a, b, w: cell_forward(
        p, a, b, w, switches, steps, multiplier, roll_like_jnp=roll_like_jnp))
    out = jax.block_until_ready(run(params, s0, s1, alphas))

    assert out.shape == (N, multiplier * C, H, W), out.shape
    assert bool(jnp.all(jnp.isfinite(out)))
    print("KERNEL_OK")
</pallas_src>

<mosaic_0001>
module attributes {stable_mosaic.version = 11 : i64} {
  func.func @_roll_probe_kernel(%arg0: memref<8x128xf32, #tpu.memory_space<vmem>>, %arg1: memref<8x128xf32, #tpu.memory_space<vmem>>) attributes {dimension_semantics = [], scalar_prefetch = 0 : i64, scratch_operands = 0 : i64, tpu.core_type = #tpu.core_type<tc>} {
    %c0 = arith.constant 0 : index
    %c0_0 = arith.constant 0 : index
    %0 = vector.load %arg0[%c0, %c0_0] : memref<8x128xf32, #tpu.memory_space<vmem>>, vector<8x128xf32>
    %c1_i32 = arith.constant 1 : i32
    %1 = tpu.dynamic_rotate %0 by %c1_i32 dim 1 : vector<8x128xf32>, i32 -> vector<8x128xf32>
    %c0_1 = arith.constant 0 : index
    %c0_2 = arith.constant 0 : index
    %2 = vector.load %arg1[%c0_1, %c0_2] : memref<8x128xf32, #tpu.memory_space<vmem>>, vector<8x128xf32>
    tpu.vector_store %arg1[%c0_1, %c0_2], %1 {strides = array<i32>} : memref<8x128xf32, #tpu.memory_space<vmem>>, vector<8x128xf32>,
    return
  }
}

</mosaic_0001>

<bundles_post_ra>
// kernel: tpu_custom_call.1
= control target key start
LH: loop header
LB: loop body
LE: loop exit
PB: predicated region body
PF: predicated region fallthrough
CT: control target
= control target key end

     0   :  { %6 = vsyncpa [#allocation3], 0  ;;  %s128_s0 = inlined_call_operand.hbm [shape: f32[8,128], index: 0, kind: input, shape index: {}]   ;;  %s129_s1 = inlined_call_operand.hbm [shape: f32[8,128], index: 1, kind: output, shape index: {}]  }
   0x1   :  { %7 = vsyncpa [#allocation4], 0  ;;  %s91_s6 = smov [#allocation2]   ;;  %s43_s10 = scalar_lea.hbm %s128_s0, 128 }
   0x2   :  { %s14_s7 = sshll.u32 %s91_s6, 4  ;;  %p44_p0 = scmp.ne.s32.totalorder %s128_s0, %s43_s10  ;;  %s15_s7 = int_to_ptr.vmem [resolvable:$true] %s14_s7 }
   0x3   :  { %p47_p1 = scmp.lt.u32.totalorder %s43_s10, %s128_s0 }
   0x5   :  { %p49_p2 = pnand %p47_p1, %p44_p0 }
   0x7   :  { %52 = shalt.err (!%p49_p2)
}
   0x8   :  { %s53_s15 = scalar_lea.vmem %s15_s7, 128  ;;  %p58_p4 = scmp.lt.s32.totalorder %s15_s7, %s15_s7 }
   0x9   :  { %p54_p3 = scmp.ne.s32.totalorder %s15_s7, %s53_s15  ;;  %p59_p5 = scmp.lt.s32.totalorder %s53_s15, %s53_s15 }
   0xb   :  { %p60_p6 = por %p59_p5, %p58_p4 }
   0xd   :  { %p61_p7 = pnand %p60_p6, %p54_p3 }
   0xf   :  { %64 = shalt.err (!%p61_p7)
}
  0x10   :  { %17 = dma.hbm_to_vmem [thread:$0]  %s128_s0, 128, %s15_s7, [#allocation3]  }
  0x11   :  { %87 = dma.done.wait [#allocation3], 128  }
  0x12   :  { %88 = vsyncadd [#allocation3], 4294967168  ;;  %v21_v0 = vld [vmem:[#allocation2] sm:$0xff]  ;;  %s92_s18 = smov 1   ;;  %s93_s19 = smov [#allocation5]  }
  0x13   :  { %22 = vrot.lane.b32.xlu0 %v21_v0, %s92_s18  ;;  %s31_s20 = sshll.u32 %s93_s19, 4  ;;  %s32_s20 = int_to_ptr.vmem [resolvable:$true] %s31_s20 }
  0x14   :  { %s65_s21 = scalar_lea.vmem %s32_s20, 128  ;;  %p70_p9 = scmp.lt.s32.totalorder %s32_s20, %s32_s20 }
  0x15   :  { %p66_p8 = scmp.ne.s32.totalorder %s32_s20, %s65_s21  ;;  %p71_p10 = scmp.lt.s32.totalorder %s65_s21, %s65_s21 }
  0x17   :  { %p72_p11 = por %p71_p10, %p70_p9 }
  0x19   :  { %p73_p12 = pnand %p72_p11, %p66_p8 }
  0x85   :  { %v23_v1 = vpop.permute.xlu0 %22 }
  0x86   :  { %24 = vst [vmem:[#allocation5] sm:$0xff] %v23_v1 }
  0x87   :  { %76 = shalt.err (!%p73_p12)
}
  0x88   :  { %s77_s0 = scalar_lea.hbm %s129_s1, 128 }
  0x89   :  { %p78_p13 = scmp.ne.s32.totalorder %s129_s1, %s77_s0  ;;  %p81_p0 = scmp.lt.u32.totalorder %s77_s0, %s129_s1 }
  0x8b   :  { %p83_p1 = pnand %p81_p0, %p78_p13 }
  0x8d   :  { %86 = shalt.err (!%p83_p1)
}
  0x8e   :  { %34 = dma.vmem_to_hbm [thread:$0]  %s32_s20, 128, %s129_s1, [#allocation4]  }
  0x8f   :  { %89 = dma.done.wait [#allocation4], 128  }
  0x90   :  { %90 = vsyncadd [#allocation4], 4294967168 }
  0x91   :  { %38 = vsyncpa [#allocation3], 1 }
  0x92   :  { %39 = vsyncpa [#allocation4], 1 }

</bundles_post_ra>
